<compile_context>
chip_gen: v7x
topology: tpu7x:2x2x1
jax: 0.10.0
libtpu: 0.0.40
codegen_flags: <defaults>
</compile_context>

<pallas_src>
import jax
import jax.numpy as jnp
from jax.experimental import pallas as pl
from jax.experimental.pallas import tpu as pltpu

_LANES = 1024       # lane-dense last dim (multiple of 128)
_TILE_ROWS = 256    # rows per grid step -> 1 MiB f32 tile per array


def _gsaci_kernel(ca_ref, gs_ref, ci_ref, an_ref):
    # An = gs * (Ca - Ci)   (pure elementwise on the VPU; never the binding slot)
    an_ref[...] = gs_ref[...] * (ca_ref[0] - ci_ref[...])


def gsaci_forward(gs: jax.Array, ci: jax.Array, ca: jax.Array) -> jax.Array:
    """Compute An = gs * (Ca - Ci) with a gridded, lane-dense Pallas TPU kernel.

    gs, ci: float32 (N,) for any N >= 1.
    ca:     float32 scalar (shape () or (1,)).
    """
    assert gs.shape == ci.shape and gs.ndim == 1
    n = gs.shape[0]

    # Pad to a multiple of the lane-dense width (at most ~4 KiB of padding).
    n_pad = pl.cdiv(n, _LANES) * _LANES
    pad = n_pad - n
    if pad:
        gs = jnp.pad(gs, (0, pad))
        ci = jnp.pad(ci, (0, pad))

    rows = n_pad // _LANES
    tile_rows = min(rows, _TILE_ROWS)        # full-array block for small N,
    grid = (pl.cdiv(rows, tile_rows),)       # pipelined grid for large N

    gs2 = gs.reshape(rows, _LANES)
    ci2 = ci.reshape(rows, _LANES)
    ca1 = jnp.asarray(ca, jnp.float32).reshape(1)

    an2 = pl.pallas_call(
        _gsaci_kernel,
        out_shape=jax.ShapeDtypeStruct((rows, _LANES), jnp.float32),
        grid=grid,
        in_specs=[
            pl.BlockSpec(memory_space=pltpu.SMEM),                # Ca scalar
            pl.BlockSpec((tile_rows, _LANES), lambda i: (i, 0)),  # gs tile
            pl.BlockSpec((tile_rows, _LANES), lambda i: (i, 0)),  # Ci tile
        ],
        out_specs=pl.BlockSpec((tile_rows, _LANES), lambda i: (i, 0)),
        compiler_params=pltpu.CompilerParams(
            dimension_semantics=("parallel",)),
    )(ca1, gs2, ci2)

    return an2.reshape(n_pad)[:n]


if __name__ == "__main__":
    key = jax.random.PRNGKey(0)
    k_small, k_big = jax.random.split(key)

    # Small setup consistent with the module's __init__:
    #   gs: 1-D tensor of stomatal conductances (len N)
    #   Ci: parameter initialized to 300.0 everywhere
    #   Ca: 400.0 (from allparameters)
    N = 256
    gs = jax.random.uniform(k_small, (N,), dtype=jnp.float32, minval=0.05, maxval=0.5)
    ci = jnp.ones((N,), dtype=jnp.float32) * 300.0
    ca = jnp.float32(400.0)

    an = jax.block_until_ready(gsaci_forward(gs, ci, ca))
    an_ref = gs * (ca - ci)
    assert an.shape == (N,) and an.dtype == jnp.float32
    assert jnp.allclose(an, an_ref, rtol=1e-6, atol=1e-6)

    # Larger batched case to exercise the gridded, pipelined path
    # (multi-step grid + partial final block + padding).
    N2 = 300_000
    gs2 = jax.random.uniform(k_big, (N2,), dtype=jnp.float32, minval=0.05, maxval=0.5)
    ci2 = jnp.ones((N2,), dtype=jnp.float32) * 300.0

    an2 = jax.block_until_ready(gsaci_forward(gs2, ci2, ca))
    an2_ref = gs2 * (ca - ci2)
    assert an2.shape == (N2,) and an2.dtype == jnp.float32
    assert jnp.allclose(an2, an2_ref, rtol=1e-6, atol=1e-6)

    print("KERNEL_OK")
</pallas_src>

<mosaic_0001>
module attributes {stable_mosaic.version = 11 : i64} {
  func.func @_gsaci_kernel(%arg0: i32, %arg1: memref<1xf32, #tpu.memory_space<smem>>, %arg2: memref<1x1024xf32, #tpu.memory_space<vmem>>, %arg3: memref<1x1024xf32, #tpu.memory_space<vmem>>, %arg4: memref<1x1024xf32, #tpu.memory_space<vmem>>) attributes {dimension_semantics = [#tpu.dimension_semantics<parallel>], iteration_bounds = array<i64: 1>, scalar_prefetch = 0 : i64, scratch_operands = 0 : i64, tpu.core_type = #tpu.core_type<tc>, window_params = [{transform_indices = @transform_0, window_bounds = array<i64: 1>}, {transform_indices = @transform_1, window_bounds = array<i64: 1, 1024>}, {transform_indices = @transform_2, window_bounds = array<i64: 1, 1024>}, {transform_indices = @transform_3, window_bounds = array<i64: 1, 1024>}]} {
    %c0 = arith.constant 0 : index
    %c0_0 = arith.constant 0 : index
    %0 = vector.load %arg2[%c0, %c0_0] : memref<1x1024xf32, #tpu.memory_space<vmem>>, vector<1x1024xf32>
    %c0_1 = arith.constant 0 : index
    %1 = memref.load %arg1[%c0_1] : memref<1xf32, #tpu.memory_space<smem>>
    %c0_2 = arith.constant 0 : index
    %c0_3 = arith.constant 0 : index
    %2 = vector.load %arg3[%c0_2, %c0_3] : memref<1x1024xf32, #tpu.memory_space<vmem>>, vector<1x1024xf32>
    %3 = vector.broadcast %1 : f32 to vector<1x1024xf32>
    %4 = arith.subf %3, %2 : vector<1x1024xf32>
    %5 = arith.mulf %0, %4 : vector<1x1024xf32>
    %c0_4 = arith.constant 0 : index
    %c0_5 = arith.constant 0 : index
    %6 = vector.load %arg4[%c0_4, %c0_5] : memref<1x1024xf32, #tpu.memory_space<vmem>>, vector<1x1024xf32>
    tpu.vector_store %arg4[%c0_4, %c0_5], %5 {strides = array<i32>} : memref<1x1024xf32, #tpu.memory_space<vmem>>, vector<1x1024xf32>,
    return
  }
  func.func @transform_0(%arg0: i32) -> i32 {
    %c0_i32 = arith.constant 0 : i32
    %c0_i32_0 = arith.constant 0 : i32
    return %c0_i32 : i32
  }
  func.func @transform_1(%arg0: i32) -> (i32, i32) {
    %c0_i32 = arith.constant 0 : i32
    %c0_i32_0 = arith.constant 0 : i32
    return %arg0, %c0_i32 : i32, i32
  }
  func.func @transform_2(%arg0: i32) -> (i32, i32) {
    %c0_i32 = arith.constant 0 : i32
    %c0_i32_0 = arith.constant 0 : i32
    return %arg0, %c0_i32 : i32, i32
  }
  func.func @transform_3(%arg0: i32) -> (i32, i32) {
    %c0_i32 = arith.constant 0 : i32
    %c0_i32_0 = arith.constant 0 : i32
    return %arg0, %c0_i32 : i32, i32
  }
}

</mosaic_0001>

<bundles_post_ra>
// kernel: tpu_custom_call.1
= control target key start
LH: loop header
LB: loop body
LE: loop exit
PB: predicated region body
PF: predicated region fallthrough
CT: control target
= control target key end

     0   :  { %9 = vsyncpa [#allocation4], 0  ;;  %s200_s0 = inlined_call_operand.<no memory space> [shape: f32[1], index: 0, kind: input, shape index: {}]   ;;  %s201_s1 = inlined_call_operand.hbm [shape: f32[1,1024], index: 1, kind: input, shape index: {}]   ;;  %s202_s2 = inlined_call_operand.hbm [shape: f32[1,1024], index: 2, kind: input, shape index: {}]   ;;  %s203_s3 = inlined_call_operand.hbm [shape: f32[1,1024], index: 3, kind: output, shape index: {}]  }
   0x1   :  { %10 = vsyncpa [#allocation7], 0 }
   0x2   :  { %11 = vsyncpa [#allocation5], 0  ;;  %s138_s12 = smov [#allocation3]   ;;  %s139_s14 = smov [#allocation6]  }
   0x3   :  { %s20_s13 = sshll.u32 %s138_s12, 4  ;;  %s30_s15 = sshll.u32 %s139_s14, 4  ;;  %s21_s13 = int_to_ptr.vmem [resolvable:$true] %s20_s13  ;;  %s31_s15 = int_to_ptr.vmem [resolvable:$true] %s30_s15 }
   0x4   :  { %s66_s18 = scalar_lea.hbm %s201_s1, 128 }
   0x5   :  { %p67_p0 = scmp.ne.s32.totalorder %s201_s1, %s66_s18  ;;  %p70_p1 = scmp.lt.u32.totalorder %s66_s18, %s201_s1 }
   0x7   :  { %p72_p2 = pnand %p70_p1, %p67_p0 }
   0x9   :  { %75 = shalt.err (!%p72_p2)
}
   0xa   :  { %s76_s23 = scalar_lea.vmem %s21_s13, 128  ;;  %p81_p4 = scmp.lt.s32.totalorder %s21_s13, %s21_s13 }
   0xb   :  { %p77_p3 = scmp.ne.s32.totalorder %s21_s13, %s76_s23  ;;  %p82_p5 = scmp.lt.s32.totalorder %s76_s23, %s76_s23 }
   0xd   :  { %p83_p6 = por %p82_p5, %p81_p4 }
   0xf   :  { %p84_p7 = pnand %p83_p6, %p77_p3 }
  0x11   :  { %87 = shalt.err (!%p84_p7)
}
  0x12   :  { %23 = dma.hbm_to_vmem [thread:$0]  %s201_s1, 128, %s21_s13, [#allocation4]  }
  0x13   :  { %s88_s28 = scalar_lea.hbm %s202_s2, 128 }
  0x14   :  { %p89_p8 = scmp.ne.s32.totalorder %s202_s2, %s88_s28  ;;  %p92_p9 = scmp.lt.u32.totalorder %s88_s28, %s202_s2 }
  0x16   :  { %p94_p10 = pnand %p92_p9, %p89_p8 }
  0x18   :  { %97 = shalt.err (!%p94_p10)
}
  0x19   :  { %s98_s6 = scalar_lea.vmem %s31_s15, 128  ;;  %p103_p12 = scmp.lt.s32.totalorder %s31_s15, %s31_s15 }
  0x1a   :  { %p99_p11 = scmp.ne.s32.totalorder %s31_s15, %s98_s6  ;;  %p104_p13 = scmp.lt.s32.totalorder %s98_s6, %s98_s6 }
  0x1c   :  { %p105_p0 = por %p104_p13, %p103_p12 }
  0x1e   :  { %p106_p1 = pnand %p105_p0, %p99_p11 }
  0x20   :  { %109 = shalt.err (!%p106_p1)
}
  0x21   :  { %33 = dma.hbm_to_vmem [thread:$0]  %s202_s2, 128, %s31_s15, [#allocation7]  }
  0x22   :  { %132 = dma.done.wait [#allocation4], 128  }
  0x23   :  { %133 = vsyncadd [#allocation4], 4294967168 }
  0x24   :  { %134 = dma.done.wait [#allocation7], 128  }
  0x25   :  { %135 = vsyncadd [#allocation7], 4294967168  ;;  %v43_v0 = vstv %s200_s0  ;;  %v40_v1 = vld [vmem:[#allocation3] sm:$0xff]  ;;  %v42_v2 = vld [vmem:[#allocation6] sm:$0xff]  ;;  %s140_s10 = smov [#allocation8]  }
  0x26   :  { %s53_s11 = sshll.u32 %s140_s10, 4  ;;  %v44_v3 = vsub.f32 %v43_v0, %v42_v2  ;;  %s54_s11 = int_to_ptr.vmem [resolvable:$true] %s53_s11 }
  0x27   :  { %s110_s12 = scalar_lea.vmem %s54_s11, 128  ;;  %p115_p3 = scmp.lt.s32.totalorder %s54_s11, %s54_s11 }
  0x28   :  { %v45_v4 = vmul.f32 %v44_v3, %v40_v1  ;;  %p111_p2 = scmp.ne.s32.totalorder %s54_s11, %s110_s12  ;;  %p116_p4 = scmp.lt.s32.totalorder %s110_s12, %s110_s12 }
  0x2a   :  { %46 = vst [vmem:[#allocation8] sm:$0xff] %v45_v4  ;;  %p117_p5 = por %p116_p4, %p115_p3 }
  0x2c   :  { %p118_p6 = pnand %p117_p5, %p111_p2 }
  0x2e   :  { %121 = shalt.err (!%p118_p6)
}
  0x2f   :  { %s122_s14 = scalar_lea.hbm %s203_s3, 128 }
  0x30   :  { %p123_p7 = scmp.ne.s32.totalorder %s203_s3, %s122_s14  ;;  %p126_p8 = scmp.lt.u32.totalorder %s122_s14, %s203_s3 }
  0x32   :  { %p128_p9 = pnand %p126_p8, %p123_p7 }
  0x34   :  { %131 = shalt.err (!%p128_p9)
}
  0x35   :  { %56 = dma.vmem_to_hbm [thread:$0]  %s54_s11, 128, %s203_s3, [#allocation5]  }
  0x36   :  { %136 = dma.done.wait [#allocation5], 128  }
  0x37   :  { %137 = vsyncadd [#allocation5], 4294967168 }
  0x38   :  { %60 = vsyncpa [#allocation4], 1 }
  0x39   :  { %61 = vsyncpa [#allocation7], 1 }
  0x3a   :  { %62 = vsyncpa [#allocation5], 1 }

</bundles_post_ra>
